<compile_context>
chip_gen: v6e
topology: v6e:2x2x1
jax: 0.10.0
libtpu: 0.0.40
codegen_flags: <defaults>
</compile_context>

<pallas_src>
import functools

import jax
import jax.numpy as jnp
from jax import lax
from jax.experimental import pallas as pl
from jax.experimental.pallas import tpu as pltpu

EPS = 1e-5  # nn.LayerNorm default


def _layernorm(x, g, b):
    mu = jnp.mean(x, axis=-1, keepdims=True)
    var = jnp.mean((x - mu) ** 2, axis=-1, keepdims=True)
    return (x - mu) * lax.rsqrt(var + EPS) * g + b


# --------------------------------------------------------------------------
# Kernel 1: embedding gather  out[i] = tok_emb[ids[i]] + pos_emb[i % T]
# The gather is expressed entirely in the index_map via scalar prefetch.
# --------------------------------------------------------------------------
def embed_kernel(ids_ref, tok_ref, pos_ref, o_ref):
    del ids_ref  # ids only drive the index_map
    o_ref[...] = tok_ref[...] + pos_ref[...]


def run_embed(ids, tok_emb, pos_emb, seq_len):
    N = ids.shape[0]
    V, C = tok_emb.shape
    T = seq_len
    tok3 = tok_emb.reshape(V, 1, C)
    pos3 = pos_emb[:T].reshape(T, 1, C)
    out = pl.pallas_call(
        embed_kernel,
        out_shape=jax.ShapeDtypeStruct((N, 1, C), jnp.float32),
        grid_spec=pltpu.PrefetchScalarGridSpec(
            num_scalar_prefetch=1,
            grid=(N,),
            in_specs=[
                pl.BlockSpec((1, 1, C), lambda i, ids_ref: (ids_ref[i], 0, 0)),
                pl.BlockSpec((1, 1, C), lambda i, ids_ref: (i % T, 0, 0)),
            ],
            out_specs=pl.BlockSpec((1, 1, C), lambda i, ids_ref: (i, 0, 0)),
        ),
        compiler_params=pltpu.CompilerParams(dimension_semantics=("arbitrary",)),
    )(ids, tok3, pos3)
    return out.reshape(N, C)


# --------------------------------------------------------------------------
# Kernel 2: all transformer blocks in one pallas_call.
# grid = (M_tiles, n_layers); output block is the resident residual stream.
# --------------------------------------------------------------------------
def blocks_kernel(x_ref, ln1g_ref, ln1b_ref, wqkv_ref, wo_ref, bo_ref,
                  ln2g_ref, ln2b_ref, w1_ref, b1_ref, w2_ref, b2_ref,
                  o_ref, att_ref, *, n_heads, seq_len):
    layer = pl.program_id(1)

    @pl.when(layer == 0)
    def _():
        o_ref[...] = x_ref[...]           # initialize residual stream for this M tile

    x = o_ref[...]                        # (tm, C) f32 running residual
    tm, C = x.shape
    H, T = n_heads, seq_len
    hs = C // H
    bb = tm // T

    # ---- attention sub-layer -------------------------------------------------
    xn = _layernorm(x, ln1g_ref[0], ln1b_ref[0]).astype(jnp.bfloat16)
    # fused Q/K/V projection: one (tm, C) x (C, 3C) matmul (scale folded into W_q).
    qkv = jnp.dot(xn, wqkv_ref[0], preferred_element_type=jnp.float32)

    row = lax.broadcasted_iota(jnp.int32, (T, T), 0)
    col = lax.broadcasted_iota(jnp.int32, (T, T), 1)
    causal = (col <= row)[None]           # (1, T, T)

    for h in range(H):                    # static loop; batched over sequences
        q = qkv[:, h * hs:(h + 1) * hs].reshape(bb, T, hs).astype(jnp.bfloat16)
        k = qkv[:, C + h * hs:C + (h + 1) * hs].reshape(bb, T, hs).astype(jnp.bfloat16)
        v = qkv[:, 2 * C + h * hs:2 * C + (h + 1) * hs].reshape(bb, T, hs).astype(jnp.bfloat16)
        wei = jnp.einsum("bqd,bkd->bqk", q, k, preferred_element_type=jnp.float32)
        wei = jnp.where(causal, wei, -1e30)               # finite mask (NaN-safe)
        wei = wei - jnp.max(wei, axis=-1, keepdims=True)
        e = jnp.exp(wei)
        p = e * pl.reciprocal(jnp.sum(e, axis=-1, keepdims=True), approx=True)
        oh = jnp.einsum("bqk,bkd->bqd", p.astype(jnp.bfloat16), v,
                        preferred_element_type=jnp.float32)
        att_ref[:, h * hs:(h + 1) * hs] = oh.reshape(tm, hs)   # write into VMEM slab

    att = jnp.dot(att_ref[...].astype(jnp.bfloat16), wo_ref[0],
                  preferred_element_type=jnp.float32) + bo_ref[0]
    x = x + att                            # residual 1 (dropout = identity)

    # ---- feed-forward sub-layer ----------------------------------------------
    xn2 = _layernorm(x, ln2g_ref[0], ln2b_ref[0]).astype(jnp.bfloat16)
    h1 = jnp.maximum(
        jnp.dot(xn2, w1_ref[0], preferred_element_type=jnp.float32) + b1_ref[0], 0.0)
    ff = jnp.dot(h1.astype(jnp.bfloat16), w2_ref[0],
                 preferred_element_type=jnp.float32) + b2_ref[0]
    o_ref[...] = x + ff                    # residual 2 (dropout = identity)


def run_blocks(x, params, n_heads, seq_len):
    M, C = x.shape
    L = params["w_qkv"].shape[0]
    assert M % seq_len == 0

    # M tile: whole sequences only; tile for megacore / MXU fill on larger configs.
    tm = M
    for cand in (256, 128):
        if M > cand and M % cand == 0 and cand % seq_len == 0:
            tm = cand
            break
    n_m = M // tm

    def wspec(arr):
        nd = arr.ndim
        return pl.BlockSpec((1,) + arr.shape[1:],
                            lambda m, l, nd=nd: (l,) + (0,) * (nd - 1))

    kernel = functools.partial(blocks_kernel, n_heads=n_heads, seq_len=seq_len)
    return pl.pallas_call(
        kernel,
        out_shape=jax.ShapeDtypeStruct((M, C), jnp.float32),
        grid=(n_m, L),
        in_specs=[
            pl.BlockSpec((tm, C), lambda m, l: (m, 0)),        # x (read at layer 0)
            wspec(params["ln1_g"]), wspec(params["ln1_b"]),
            wspec(params["w_qkv"]),
            wspec(params["w_proj"]), wspec(params["b_proj"]),
            wspec(params["ln2_g"]), wspec(params["ln2_b"]),
            wspec(params["w_ff1"]), wspec(params["b_ff1"]),
            wspec(params["w_ff2"]), wspec(params["b_ff2"]),
        ],
        out_specs=pl.BlockSpec((tm, C), lambda m, l: (m, 0)),  # resident across layers
        scratch_shapes=[pltpu.VMEM((tm, C), jnp.float32)],     # head-output slab
        input_output_aliases={0: 0},                           # reuse x's HBM buffer
        compiler_params=pltpu.CompilerParams(
            dimension_semantics=("parallel", "arbitrary")),
    )(x, params["ln1_g"], params["ln1_b"], params["w_qkv"],
      params["w_proj"], params["b_proj"], params["ln2_g"], params["ln2_b"],
      params["w_ff1"], params["b_ff1"], params["w_ff2"], params["b_ff2"])


# --------------------------------------------------------------------------
# Kernel 3: final LayerNorm + lm_head, tiled over a 128-padded vocab.
# --------------------------------------------------------------------------
def lmhead_kernel(x_ref, lnfg_ref, lnfb_ref, wlm_ref, blm_ref, o_ref):
    xn = _layernorm(x_ref[...], lnfg_ref[...], lnfb_ref[...]).astype(jnp.bfloat16)
    o_ref[...] = (jnp.dot(xn, wlm_ref[...], preferred_element_type=jnp.float32)
                  + blm_ref[...])


def run_lmhead(x, lnf_g, lnf_b, w_lm, b_lm):
    M, C = x.shape
    Vp = w_lm.shape[1]
    tv = 512 if Vp % 512 == 0 else (256 if Vp % 256 == 0 else 128)
    tv = min(tv, Vp)
    tm = M
    return pl.pallas_call(
        lmhead_kernel,
        out_shape=jax.ShapeDtypeStruct((M, Vp), jnp.float32),
        grid=(M // tm, Vp // tv),
        in_specs=[
            pl.BlockSpec((tm, C), lambda m, v: (m, 0)),
            pl.BlockSpec((1, C), lambda m, v: (0, 0)),
            pl.BlockSpec((1, C), lambda m, v: (0, 0)),
            pl.BlockSpec((C, tv), lambda m, v: (0, v)),
            pl.BlockSpec((1, tv), lambda m, v: (0, v)),
        ],
        out_specs=pl.BlockSpec((tm, tv), lambda m, v: (m, v)),
        compiler_params=pltpu.CompilerParams(
            dimension_semantics=("parallel", "parallel")),
    )(x, lnf_g, lnf_b, w_lm, b_lm)


# --------------------------------------------------------------------------
# Full forward
# --------------------------------------------------------------------------
def nacjac_forward(idx, params, n_heads):
    """Equivalent of NACJAC_LangModel.forward(idx, targets=None) -> logits."""
    B, T = idx.shape
    V = params["vocab_size"]
    ids = idx.reshape(-1).astype(jnp.int32)                     # (B*T,)
    x = run_embed(ids, params["tok_emb"], params["pos_emb"], T)  # (B*T, C)
    x = run_blocks(x, params, n_heads, T)                        # (B*T, C)
    logits = run_lmhead(x, params["lnf_g"], params["lnf_b"],
                        params["w_lm"], params["b_lm"])          # (B*T, Vpad)
    return logits[:, :V].reshape(B, T, V)


# --------------------------------------------------------------------------
# Deterministic synthetic parameters
# --------------------------------------------------------------------------
def init_params(key, vocab_size, n_embed, n_heads, block_size, n_layers):
    C, L = n_embed, n_layers
    hid = 4 * C
    Vp = ((vocab_size + 127) // 128) * 128
    keys = iter(jax.random.split(key, 16))

    def w(shape, scale=0.02):
        return scale * jax.random.normal(next(keys), shape, dtype=jnp.float32)

    wq = w((L, C, C)) * (C ** -0.5)   # fold the reference's 1/sqrt(n_embed) score scale
    wk = w((L, C, C))
    wv = w((L, C, C))
    w_qkv = jnp.concatenate([wq, wk, wv], axis=-1).astype(jnp.bfloat16)  # (L, C, 3C)

    params = {
        "vocab_size": vocab_size,
        "tok_emb": w((vocab_size, C), 1.0),
        "pos_emb": w((block_size, C), 1.0),
        "ln1_g": jnp.ones((L, 1, C), jnp.float32),
        "ln1_b": jnp.zeros((L, 1, C), jnp.float32),
        "w_qkv": w_qkv,
        "w_proj": w((L, C, C)).astype(jnp.bfloat16),
        "b_proj": jnp.zeros((L, 1, C), jnp.float32),
        "ln2_g": jnp.ones((L, 1, C), jnp.float32),
        "ln2_b": jnp.zeros((L, 1, C), jnp.float32),
        "w_ff1": w((L, C, hid)).astype(jnp.bfloat16),
        "b_ff1": jnp.zeros((L, 1, hid), jnp.float32),
        "w_ff2": w((L, hid, C)).astype(jnp.bfloat16),
        "b_ff2": jnp.zeros((L, 1, C), jnp.float32),
        "lnf_g": jnp.ones((1, C), jnp.float32),
        "lnf_b": jnp.zeros((1, C), jnp.float32),
        "w_lm": jnp.pad(w((C, vocab_size)),
                        ((0, 0), (0, Vp - vocab_size))).astype(jnp.bfloat16),
        "b_lm": jnp.zeros((1, Vp), jnp.float32),
    }
    return params


if __name__ == "__main__":
    VOCAB = 64
    N_EMBED = 32
    N_HEADS = 4
    BLOCK_SIZE = 8
    N_LAYERS = 2
    B, T = 2, BLOCK_SIZE

    key = jax.random.PRNGKey(0)
    k_idx, k_params = jax.random.split(key)
    idx = jax.random.randint(k_idx, (B, T), 0, VOCAB, dtype=jnp.int32)
    params = init_params(k_params, VOCAB, N_EMBED, N_HEADS, BLOCK_SIZE, N_LAYERS)

    logits = nacjac_forward(idx, params, N_HEADS)
    logits = jax.block_until_ready(logits)

    assert logits.shape == (B, T, VOCAB), logits.shape
    assert bool(jnp.all(jnp.isfinite(logits)))
    print("KERNEL_OK")
</pallas_src>

<mosaic_0001>
module attributes {stable_mosaic.version = 11 : i64} {
  func.func @embed_kernel(%arg0: i32, %arg1: memref<16xi32, #tpu.memory_space<smem>>, %arg2: memref<1x1x32xf32, #tpu.memory_space<vmem>>, %arg3: memref<1x1x32xf32, #tpu.memory_space<vmem>>, %arg4: memref<1x1x32xf32, #tpu.memory_space<vmem>>) attributes {dimension_semantics = [#tpu.dimension_semantics<arbitrary>], iteration_bounds = array<i64: 16>, scalar_prefetch = 1 : i64, scratch_operands = 0 : i64, tpu.core_type = #tpu.core_type<tc>, window_params = [{transform_indices = @transform_0, window_bounds = array<i64: 1, 1, 32>}, {transform_indices = @transform_1, window_bounds = array<i64: 1, 1, 32>}, {transform_indices = @transform_2, window_bounds = array<i64: 1, 1, 32>}]} {
    %c0 = arith.constant 0 : index
    %c0_0 = arith.constant 0 : index
    %c0_1 = arith.constant 0 : index
    %0 = vector.load %arg2[%c0, %c0_0, %c0_1] : memref<1x1x32xf32, #tpu.memory_space<vmem>>, vector<1x1x32xf32>
    %c0_2 = arith.constant 0 : index
    %c0_3 = arith.constant 0 : index
    %c0_4 = arith.constant 0 : index
    %1 = vector.load %arg3[%c0_2, %c0_3, %c0_4] : memref<1x1x32xf32, #tpu.memory_space<vmem>>, vector<1x1x32xf32>
    %2 = arith.addf %0, %1 : vector<1x1x32xf32>
    %c0_5 = arith.constant 0 : index
    %c0_6 = arith.constant 0 : index
    %c0_7 = arith.constant 0 : index
    %3 = vector.load %arg4[%c0_5, %c0_6, %c0_7] : memref<1x1x32xf32, #tpu.memory_space<vmem>>, vector<1x1x32xf32>
    tpu.vector_store %arg4[%c0_5, %c0_6, %c0_7], %2 {strides = array<i32>} : memref<1x1x32xf32, #tpu.memory_space<vmem>>, vector<1x1x32xf32>,
    return
  }
  func.func @transform_0(%arg0: i32, %arg1: memref<16xi32, #tpu.memory_space<smem>>) -> (i32, i32, i32) {
    %0 = arith.index_cast %arg0 : i32 to index
    %1 = memref.load %arg1[%0] : memref<16xi32, #tpu.memory_space<smem>>
    %c0_i32 = arith.constant 0 : i32
    %c0_i32_0 = arith.constant 0 : i32
    %c0_i32_1 = arith.constant 0 : i32
    return %1, %c0_i32, %c0_i32_0 : i32, i32, i32
  }
  func.func @transform_1(%arg0: i32, %arg1: memref<16xi32, #tpu.memory_space<smem>>) -> (i32, i32, i32) {
    %c8_i32 = arith.constant 8 : i32
    %c0_i32 = arith.constant 0 : i32
    %0 = arith.cmpi eq, %c8_i32, %c0_i32 : i32
    %c1_i32 = arith.constant 1 : i32
    %1 = arith.select %0, %c1_i32, %c8_i32 : i32
    %2 = arith.remsi %arg0, %1 : i32
    %c0_i32_0 = arith.constant 0 : i32
    %3 = arith.cmpi ne, %2, %c0_i32_0 : i32
    %c0_i32_1 = arith.constant 0 : i32
    %4 = arith.cmpi slt, %2, %c0_i32_1 : i32
    %c0_i32_2 = arith.constant 0 : i32
    %5 = arith.cmpi slt, %1, %c0_i32_2 : i32
    %6 = arith.xori %4, %5 : i1
    %7 = arith.andi %6, %3 : i1
    %8 = arith.addi %2, %1 : i32
    %9 = arith.select %7, %8, %2 : i32
    %c0_i32_3 = arith.constant 0 : i32
    %c0_i32_4 = arith.constant 0 : i32
    %c0_i32_5 = arith.constant 0 : i32
    return %9, %c0_i32_3, %c0_i32_4 : i32, i32, i32
  }
  func.func @transform_2(%arg0: i32, %arg1: memref<16xi32, #tpu.memory_space<smem>>) -> (i32, i32, i32) {
    %c0_i32 = arith.constant 0 : i32
    %c0_i32_0 = arith.constant 0 : i32
    %c0_i32_1 = arith.constant 0 : i32
    return %arg0, %c0_i32, %c0_i32_0 : i32, i32, i32
  }
}

</mosaic_0001>

<bundles_post_ra>
// kernel: tpu_custom_call.1
= control target key start
LH: loop header
LB: loop body
LE: loop exit
PB: predicated region body
PF: predicated region fallthrough
CT: control target
= control target key end

     0   :  { %s581_s0 = inlined_call_operand.vmem [shape: s32[16], index: 0, kind: input, shape index: {}]   ;;  %s582_s1 = inlined_call_operand.vmem [shape: f32[64,1,32], index: 1, kind: input, shape index: {}]   ;;  %s583_s2 = inlined_call_operand.vmem [shape: f32[8,1,32], index: 2, kind: input, shape index: {}]   ;;  %s584_s3 = inlined_call_operand.hbm [shape: f32[16,1,32], index: 3, kind: output, shape index: {}]  }
   0x1   :  { %s8_s14 = sshll.u32 %s581_s0, 4  ;;  %s9_s14 = int_to_ptr.vmem [resolvable:$true] %s8_s14 }
   0x2   :  { %s382_s15 = scalar_lea.vmem %s9_s14, 16  ;;  %p387_p1 = scmp.lt.s32.totalorder %s9_s14, %s9_s14 }
   0x3   :  { %p383_p0 = scmp.ne.s32.totalorder %s9_s14, %s382_s15  ;;  %p388_p2 = scmp.lt.s32.totalorder %s382_s15, %s382_s15 }
   0x5   :  { %p389_p3 = por %p388_p2, %p387_p1 }
   0x7   :  { %p390_p4 = pnand %p389_p3, %p383_p0 }
   0x9   :  { %393 = shalt.err (!%p390_p4)  }
   0xa   :  { %s458_s16 = smov [#allocation3]  }
   0xb   :  { %11 = dma.vmem_to_smem %s9_s14, 16, %s458_s16, [#allocation2] }
   0xc   :  { %436 = dma.done.wait [#allocation2], 16 }
   0xd   :  { %437 = vsyncadd [#allocation2], 4294967280 }
   0xe   :  { %13 = sfence }
   0xf   :  { %14 = vsyncpa [#allocation5], 0 }
  0x10   :  { %16 = vsyncpa [#allocation5 + $0x1], 0  ;;  %s483_s17 = smov 0   ;;  %s485_s18 = smov 0  }
  0x11   :  { %s487_s0 = smov 0   ;;  %s489_s19 = smov 0  }
  0x12 LB: > { %s504_s20 = sadd.s32 4294967295, %s456_s19   ;;  %s326_s21 = sadd.s32 4294967294, %s456_s19   ;;  %s456_s19 = sphi %s489_s19, %s590_s19   ;;  %s452_s0 = sphi %s487_s0, %s589_s0   ;;  %s448_s18 = sphi %s485_s18, %s588_s18   ;;  %s444_s17 = sphi %s483_s17, %s587_s17  }
  0x13   : > { %s508_s22 = sadd.s32 1, %s456_s19   ;;  %s107_s23 = sadd.s32 1, %s452_s0 }
  0x14   : > { %s104_s24 = ssub.s32 %s456_s19, %s508_s22  ;;  %p117_p5 = scmp.ne.s32.totalorder %s452_s0, %s448_s18 }
  0x15   : > { %p105_p6 = scmp.eq.s32.totalorder %s104_s24, 0  ;;  %p118_p7 = scmp.eq.s32.totalorder %s504_s20, 15 }
  0x16   : > { %p123_p8 = scmp.ne.s32.totalorder %s448_s18, %s444_s17  ;;  %p124_p9 = scmp.eq.s32.totalorder %s326_s21, 15 }
  0x17   : > { %s519_s25 = scalar_select %p105_p6, %s452_s0, %s107_s23  }
  0x18   : > { %p521_p10 = por %p118_p7, %p117_p5  ;;  %p525_p11 = por %p124_p9, %p123_p8 }
  0x19   : > { %p335_p12 = scmp.ge.s32.totalorder %s456_s19, 1  ;;  %p180_p13 = scmp.lt.s32.totalorder %s456_s19, 17 }
  0x1b   : > { %p181_p0 = pnand %p335_p12, %p180_p13 }
  0x1c   : > { %s215_s28 = sld [smem:[#allocation3 + %s504_s20]] (!%p181_p0)  ;;  %s221_s29 = ssub.s32 (!%p181_p0), 0, %s504_s20 }
  0x1d   : > { %184 = sbr.rel (%p181_p0) target bundleno = 61 (0x3d), region = 28  ;;  %p220_p1 = scmp.lt.s32.totalorder (!%p181_p0), %s504_s20, 0 }
  0x1e   : > { %s336_s30 = smin.u32 (!%p181_p0), %s504_s20, %s221_s29  ;;  %s213_s6 = sand.u32 (!%p181_p0), 1, %s448_s18  }
  0x1f   : > { %s223_s4 = sand.u32 (!%p181_p0), 7, %s336_s30   ;;  %s214_s11 = scalar_lea.vmem (!%p181_p0), [#allocation4], %s213_s6 }
  0x20   : > { %s224_s5 = ssub.s32 (!%p181_p0), 0, %s223_s4  ;;  %s265_s12 = sshll.u32 (!%p181_p0), %s214_s11, 4  ;;  %s543_s12 = int_to_ptr.vmem [resolvable:$true] %s265_s12 }
  0x21   : > { %s339_s13 = sshll.u32 (!%p181_p0), %s504_s20, 4  ;;  %s394_s29 = scalar_lea.vmem (!%p181_p0), %s543_s12, 16 }
  0x22   : > { %p216_p2 = scmp.lt.s32.totalorder %s215_s28, 63  ;;  %s592_s5 = smov (!%p220_p1, %s224_s5), %s223_s4  ;;  %vm250_vm0 = vcmask 253952  }
  0x23   : > { %p338_p3 = scmp.lt.s32.totalorder %s592_s5, 0  ;;  %s230_s7 = sadd.s32 8, %s592_s5 }
  0x24   : > { %s594_s28 = smov (!%p216_p2, %s215_s28), 63  ;;  %s263_s24 = scalar_lea.hbm %s584_s3, %s339_s13 }
  0x25   : > { %s596_s7 = smov (!%p338_p3, %s230_s7), %s592_s5  ;;  %s218_s10 = scalar_lea.vmem %s582_s1, %s594_s28 }
  0x26   : > { %p232_p4 = scmp.lt.s32.totalorder %s596_s7, 7  ;;  %v247_v0 = vld [vmem:[%s218_s10] sm:$0x1]  ;;  %s253_s28 = scalar_lea.sflag [#allocation5], %s213_s6 }
  0x27   : > { %p395_p5 = scmp.ne.s32.totalorder %s543_s12, %s394_s29  ;;  %s459_s20 = smov [#allocation4]  }
  0x28   : > { %s598_s7 = smov (!%p232_p4, %s596_s7), 7  ;;  %s398_s30 = sshll.u32 %s459_s20, 4  ;;  %s399_s30 = int_to_ptr.vmem [resolvable:$false] %s398_s30 }
  0x29   : > { %s234_s16 = scalar_lea.vmem %s583_s2, %s598_s7  ;;  %p396_p6 = pnand %p395_p5, %p521_p10 }
  0x2a   : > { %v248_v1 = vld [vmem:[%s234_s16] sm:$0x1]  ;;  %s400_s4 = scalar_lea.vmem %s399_s30, 32  ;;  %p401_p8 = scmp.lt.s32.totalorder %s543_s12, %s399_s30 }
  0x2b   : > { %v249_v2 = vadd.f32 %v248_v1, %v247_v0  ;;  %p397_p7 = pneg %p396_p6  ;;  %p402_p9 = scmp.lt.s32.totalorder %s400_s4, %s394_s29 }
  0x2d   : > { %251 = vst.msk [vmem:[%s214_s11] sm:$0x1] %vm250_vm0, %v249_v2  ;;  %p403_p12 = por %p402_p9, %p401_p8 }
  0x2f   : > { %p404_p13 = pnand %p403_p12, %p397_p7 }
  0x31   : > { %407 = shalt.err (!%p404_p13)
}
  0x32   : > { %s408_s5 = scalar_lea.hbm %s263_s24, 16  ;;  %s412_s8 = scalar_lea.hbm %s584_s3, 256 }
  0x33   : > { %p409_p0 = scmp.ne.s32.totalorder %s263_s24, %s408_s5  ;;  %p413_p3 = scmp.lt.s32.totalorder %s263_s24, %s584_s3 }
  0x34   : > { %p414_p4 = scmp.lt.s32.totalorder %s412_s8, %s408_s5 }
  0x35   : > { %p410_p1 = pnand %p409_p0, %p521_p10 }
  0x36   : > { %p415_p5 = por %p414_p4, %p413_p3 }
  0x37   : > { %p411_p2 = pneg %p410_p1 }
  0x39   : > { %p416_p6 = pnand %p415_p5, %p411_p2 }
  0x3b   : > { %419 = shalt.err (!%p416_p6)
}
  0x3c   : > { %342 = dma.vmem_to_hbm [thread:$0]  (%p521_p10), %s543_s12, 16, %s263_s24, %s253_s28  }
  0x3d PF: > { %p348_p7 = scmp.ge.s32.totalorder %s456_s19, 2  ;;  %s277_s11 = sand.u32 1, %s444_s17  }
  0x3e   : > { %s278_s13 = scalar_lea.sflag [#allocation5], %s277_s11 }
  0x3f   : > { %p345_p8 = pnand %p348_p7, %p525_p11 }
  0x41   : > { %p346_p9 = pneg %p345_p8 }
  0x43   : > { %439 = dma.done.wait (%p346_p9), %s278_s13, 16  }
  0x44   : > { %441 = vsyncadd (%p346_p9), %s278_s13, 4294967280  ;;  %p19_p12 = scmp.ge.s32.totalorder %s508_s22, 18   ;;  %s587_s17 = smov %s448_s18 }
  0x45   : > { %s588_s18 = smov %s452_s0  ;;  %s589_s0 = smov %s519_s25 }
  0x46   : > { %s590_s19 = smov %s508_s22  ;;  %21 = sbr.rel (!%p19_p12) target bundleno = 18 (0x12), region = 66 }
  0x4b   :  { %282 = vsyncpa [#allocation5], 1 }
  0x4c   :  { %284 = vsyncpa [#allocation5 + $0x1], 1 }

</bundles_post_ra>
